<compile_context>
chip_gen: v5e
topology: v5e:2x2
jax: 0.10.0
libtpu: 0.0.40
codegen_flags: <defaults>
</compile_context>

<pallas_src>
import functools
import math

import jax
import jax.numpy as jnp
from jax import lax
from jax.experimental import pallas as pl
from jax.experimental.pallas import tpu as pltpu

C_IN = 128          # conv1 in_channels (from the module __init__)
C_OUT = 3           # conv2 out_channels


# --------------------------------------------------------------------------
# Fused kernel: conv1 (1x1, pad=1) -> pad -> conv2 (2x2, pad=1) -> + other
#               -> + padding1, all in a single VMEM-resident block.
#
#   x_ref     : (C_IN, H*W)          VMEM   lane-dense conv1 input
#   w1_ref    : (8, C_IN)            VMEM   conv1 taps in row 0, rows 1..7 zero
#   b1_ref    : (1,)                 SMEM   conv1 bias
#   w2_ref    : (C_OUT*4,)           SMEM   conv2 taps, [4*o + 2*ki + kj]
#   b2_ref    : (C_OUT,)             SMEM   conv2 bias
#   other_ref : (1, C_OUT, Ho, Wo)   VMEM
#   pad1_ref  : (1, C_OUT, Ho, Wo)   VMEM
#   out_ref   : (1, C_OUT, Ho, Wo)   VMEM
#   v1z_ref   : (Ho+1, Wo+1) f32     VMEM scratch (zero-padded conv1 output)
# --------------------------------------------------------------------------
def fused_kernel(x_ref, w1_ref, b1_ref, w2_ref, b2_ref, other_ref, pad1_ref,
                 out_ref, v1z_ref, *, H, W):
    Ho, Wo = H + 3, W + 3
    Hz, Wz = Ho + 1, Wo + 1
    b1 = b1_ref[0]

    # ---- conv1 interior as a single MXU matmul over channels ----
    # (8, C_IN) @ (C_IN, H*W) -> (8, H*W); only row 0 is meaningful.
    y_mat = jnp.dot(w1_ref[...], x_ref[...],
                    preferred_element_type=jnp.float32) + b1       # (8, H*W)

    # ---- build conv2's zero-padded input in scratch (direct fills) ----
    # outer ring (conv2 padding=1)                       -> 0
    # next ring  (conv1 padding=1 through a 1x1 conv)    -> b1
    # interior                                           -> conv1 output
    v1z_ref[...] = jnp.zeros((Hz, Wz), jnp.float32)
    v1z_ref[1:Hz - 1, 1:Wz - 1] = jnp.full((Hz - 2, Wz - 2), b1, jnp.float32)
    for h in range(H):   # unrolled row scatter of the flat matmul result
        v1z_ref[2 + h:3 + h, 2:2 + W] = y_mat[0:1, h * W:(h + 1) * W]

    # ---- conv2 (2x2 stencil) + elementwise adds ----
    v1z = v1z_ref[...]                       # (Hz, Wz)
    # hoisted shifted views, reused for all 3 output channels
    s00 = v1z[0:Ho, 0:Wo]
    s01 = v1z[0:Ho, 1:1 + Wo]
    s10 = v1z[1:1 + Ho, 0:Wo]
    s11 = v1z[1:1 + Ho, 1:1 + Wo]
    for o in range(C_OUT):
        conv = (w2_ref[4 * o + 0] * s00 + w2_ref[4 * o + 1] * s01
                + w2_ref[4 * o + 2] * s10 + w2_ref[4 * o + 3] * s11)
        out_ref[0, o] = conv + b2_ref[o] + other_ref[0, o] + pad1_ref[0, o]


# --------------------------------------------------------------------------
# Wrapper: one pallas_call, no grid; only free layout plumbing outside.
# --------------------------------------------------------------------------
@jax.jit
def model_forward(x, w1, b1, w2, b2, other, pad1):
    N, C, H, W = x.shape
    assert N == 1 and C == C_IN
    Ho, Wo = H + 3, W + 3

    # Layout plumbing only: lane-dense rhs for the MXU, w1 padded to a native
    # (8, C_IN) sublane tile.  No compute is hoisted out of the kernel.
    x_mat = x.reshape(C_IN, H * W)
    w1_rows = jnp.zeros((8, C_IN), jnp.float32).at[0].set(w1)

    vmem = pl.BlockSpec(memory_space=pltpu.MemorySpace.VMEM)
    smem = pl.BlockSpec(memory_space=pltpu.MemorySpace.SMEM)

    out = pl.pallas_call(
        functools.partial(fused_kernel, H=H, W=W),
        out_shape=jax.ShapeDtypeStruct((1, C_OUT, Ho, Wo), jnp.float32),
        in_specs=[vmem, vmem, smem, smem, smem, vmem, vmem],
        out_specs=vmem,
        scratch_shapes=[pltpu.VMEM((Ho + 1, Wo + 1), jnp.float32)],
    )(x_mat, w1_rows, b1, w2, b2, other, pad1)
    return out                               # (1, 3, Ho, Wo) NCHW


# --------------------------------------------------------------------------
# Pure-JAX reference (independent, via lax.conv)
# --------------------------------------------------------------------------
def reference(x, w1, b1, w2, b2, other, pad1):
    w1_4d = w1.reshape(1, C_IN, 1, 1)
    w2_4d = w2.reshape(C_OUT, 1, 2, 2)
    dn = ("NCHW", "OIHW", "NCHW")
    v1 = lax.conv_general_dilated(x, w1_4d, (1, 1), [(1, 1), (1, 1)],
                                  dimension_numbers=dn) + b1.reshape(1, 1, 1, 1)
    v2 = lax.conv_general_dilated(v1, w2_4d, (1, 1), [(1, 1), (1, 1)],
                                  dimension_numbers=dn) + b2.reshape(1, C_OUT, 1, 1)
    return v2 + other + pad1


if __name__ == "__main__":
    H = W = 16
    Ho, Wo = H + 3, W + 3

    key = jax.random.PRNGKey(0)
    k0, k1, k2, k3, k4, k5, k6 = jax.random.split(key, 7)

    # Deterministic PyTorch-style uniform init (±1/sqrt(fan_in)).
    bound1 = 1.0 / math.sqrt(C_IN * 1 * 1)
    w1 = jax.random.uniform(k0, (C_IN,), jnp.float32, -bound1, bound1)
    b1 = jax.random.uniform(k1, (1,), jnp.float32, -bound1, bound1)
    bound2 = 1.0 / math.sqrt(1 * 2 * 2)
    w2 = jax.random.uniform(k2, (C_OUT * 4,), jnp.float32, -bound2, bound2)
    b2 = jax.random.uniform(k3, (C_OUT,), jnp.float32, -bound2, bound2)

    x = jax.random.normal(k4, (1, C_IN, H, W), jnp.float32)
    other = jax.random.normal(k5, (1, C_OUT, Ho, Wo), jnp.float32)
    pad1 = jax.random.normal(k6, (1, C_OUT, Ho, Wo), jnp.float32)

    out = model_forward(x, w1, b1, w2, b2, other, pad1)
    jax.block_until_ready(out)

    ref = reference(x, w1, b1, w2, b2, other, pad1)
    assert out.shape == (1, C_OUT, Ho, Wo), out.shape
    assert jnp.allclose(out, ref, rtol=2e-2, atol=2e-2), (
        float(jnp.max(jnp.abs(out - ref))))

    print("KERNEL_OK")
</pallas_src>

<mosaic_0001>
module attributes {stable_mosaic.version = 11 : i64} {
  func.func @fused_kernel(%arg0: memref<128x256xf32, #tpu.memory_space<vmem>>, %arg1: memref<8x128xf32, #tpu.memory_space<vmem>>, %arg2: memref<1xf32, #tpu.memory_space<smem>>, %arg3: memref<12xf32, #tpu.memory_space<smem>>, %arg4: memref<3xf32, #tpu.memory_space<smem>>, %arg5: memref<1x3x19x19xf32, #tpu.memory_space<vmem>>, %arg6: memref<1x3x19x19xf32, #tpu.memory_space<vmem>>, %arg7: memref<1x3x19x19xf32, #tpu.memory_space<vmem>>, %arg8: memref<20x20xf32, #tpu.memory_space<vmem>>) attributes {dimension_semantics = [], scalar_prefetch = 0 : i64, scratch_operands = 1 : i64, tpu.core_type = #tpu.core_type<tc>} {
    %c0 = arith.constant 0 : index
    %0 = memref.load %arg2[%c0] : memref<1xf32, #tpu.memory_space<smem>>
    %c0_0 = arith.constant 0 : index
    %c0_1 = arith.constant 0 : index
    %1 = vector.load %arg1[%c0_0, %c0_1] : memref<8x128xf32, #tpu.memory_space<vmem>>, vector<8x128xf32>
    %c0_2 = arith.constant 0 : index
    %c0_3 = arith.constant 0 : index
    %2 = vector.load %arg0[%c0_2, %c0_3] : memref<128x256xf32, #tpu.memory_space<vmem>>, vector<128x256xf32>
    %cst = arith.constant dense<0.000000e+00> : vector<8x256xf32>
    %3 = tpu.matmul %1, %2, %cst {dimension_numbers = #tpu.dot_dimension_numbers<[1], [0], [0], [1], [0, 0, 1, 1], [], []>} : vector<8x128xf32>, vector<128x256xf32>, vector<8x256xf32> -> vector<8x256xf32>
    %4 = vector.broadcast %0 : f32 to vector<8x256xf32>
    %5 = arith.addf %3, %4 : vector<8x256xf32>
    %cst_4 = arith.constant 0.000000e+00 : f32
    %6 = vector.broadcast %cst_4 : f32 to vector<20x20xf32>
    %c0_5 = arith.constant 0 : index
    %c0_6 = arith.constant 0 : index
    %7 = vector.load %arg8[%c0_5, %c0_6] : memref<20x20xf32, #tpu.memory_space<vmem>>, vector<20x20xf32>
    tpu.vector_store %arg8[%c0_5, %c0_6], %6 {strides = array<i32>} : memref<20x20xf32, #tpu.memory_space<vmem>>, vector<20x20xf32>,
    %8 = vector.broadcast %0 : f32 to vector<18x18xf32>
    %c1 = arith.constant 1 : index
    %c1_7 = arith.constant 1 : index
    %9 = vector.load %arg8[%c1, %c1_7] : memref<20x20xf32, #tpu.memory_space<vmem>>, vector<18x18xf32>
    tpu.vector_store %arg8[%c1, %c1_7], %8 {strides = array<i32>} : memref<20x20xf32, #tpu.memory_space<vmem>>, vector<18x18xf32>,
    %10 = vector.extract_strided_slice %5 {offsets = [0, 0], sizes = [1, 16], strides = [1, 1]} : vector<8x256xf32> to vector<1x16xf32>
    %c2 = arith.constant 2 : index
    %c2_8 = arith.constant 2 : index
    %11 = vector.load %arg8[%c2, %c2_8] : memref<20x20xf32, #tpu.memory_space<vmem>>, vector<1x16xf32>
    tpu.vector_store %arg8[%c2, %c2_8], %10 {strides = array<i32>} : memref<20x20xf32, #tpu.memory_space<vmem>>, vector<1x16xf32>,
    %12 = vector.extract_strided_slice %5 {offsets = [0, 16], sizes = [1, 16], strides = [1, 1]} : vector<8x256xf32> to vector<1x16xf32>
    %c3 = arith.constant 3 : index
    %c2_9 = arith.constant 2 : index
    %13 = vector.load %arg8[%c3, %c2_9] : memref<20x20xf32, #tpu.memory_space<vmem>>, vector<1x16xf32>
    tpu.vector_store %arg8[%c3, %c2_9], %12 {strides = array<i32>} : memref<20x20xf32, #tpu.memory_space<vmem>>, vector<1x16xf32>,
    %14 = vector.extract_strided_slice %5 {offsets = [0, 32], sizes = [1, 16], strides = [1, 1]} : vector<8x256xf32> to vector<1x16xf32>
    %c4 = arith.constant 4 : index
    %c2_10 = arith.constant 2 : index
    %15 = vector.load %arg8[%c4, %c2_10] : memref<20x20xf32, #tpu.memory_space<vmem>>, vector<1x16xf32>
    tpu.vector_store %arg8[%c4, %c2_10], %14 {strides = array<i32>} : memref<20x20xf32, #tpu.memory_space<vmem>>, vector<1x16xf32>,
    %16 = vector.extract_strided_slice %5 {offsets = [0, 48], sizes = [1, 16], strides = [1, 1]} : vector<8x256xf32> to vector<1x16xf32>
    %c5 = arith.constant 5 : index
    %c2_11 = arith.constant 2 : index
    %17 = vector.load %arg8[%c5, %c2_11] : memref<20x20xf32, #tpu.memory_space<vmem>>, vector<1x16xf32>
    tpu.vector_store %arg8[%c5, %c2_11], %16 {strides = array<i32>} : memref<20x20xf32, #tpu.memory_space<vmem>>, vector<1x16xf32>,
    %18 = vector.extract_strided_slice %5 {offsets = [0, 64], sizes = [1, 16], strides = [1, 1]} : vector<8x256xf32> to vector<1x16xf32>
    %c6 = arith.constant 6 : index
    %c2_12 = arith.constant 2 : index
    %19 = vector.load %arg8[%c6, %c2_12] : memref<20x20xf32, #tpu.memory_space<vmem>>, vector<1x16xf32>
    tpu.vector_store %arg8[%c6, %c2_12], %18 {strides = array<i32>} : memref<20x20xf32, #tpu.memory_space<vmem>>, vector<1x16xf32>,
    %20 = vector.extract_strided_slice %5 {offsets = [0, 80], sizes = [1, 16], strides = [1, 1]} : vector<8x256xf32> to vector<1x16xf32>
    %c7 = arith.constant 7 : index
    %c2_13 = arith.constant 2 : index
    %21 = vector.load %arg8[%c7, %c2_13] : memref<20x20xf32, #tpu.memory_space<vmem>>, vector<1x16xf32>
    tpu.vector_store %arg8[%c7, %c2_13], %20 {strides = array<i32>} : memref<20x20xf32, #tpu.memory_space<vmem>>, vector<1x16xf32>,
    %22 = vector.extract_strided_slice %5 {offsets = [0, 96], sizes = [1, 16], strides = [1, 1]} : vector<8x256xf32> to vector<1x16xf32>
    %c8 = arith.constant 8 : index
    %c2_14 = arith.constant 2 : index
    %23 = vector.load %arg8[%c8, %c2_14] : memref<20x20xf32, #tpu.memory_space<vmem>>, vector<1x16xf32>
    tpu.vector_store %arg8[%c8, %c2_14], %22 {strides = array<i32>} : memref<20x20xf32, #tpu.memory_space<vmem>>, vector<1x16xf32>,
    %24 = vector.extract_strided_slice %5 {offsets = [0, 112], sizes = [1, 16], strides = [1, 1]} : vector<8x256xf32> to vector<1x16xf32>
    %c9 = arith.constant 9 : index
    %c2_15 = arith.constant 2 : index
    %25 = vector.load %arg8[%c9, %c2_15] : memref<20x20xf32, #tpu.memory_space<vmem>>, vector<1x16xf32>
    tpu.vector_store %arg8[%c9, %c2_15], %24 {strides = array<i32>} : memref<20x20xf32, #tpu.memory_space<vmem>>, vector<1x16xf32>,
    %26 = vector.extract_strided_slice %5 {offsets = [0, 128], sizes = [1, 16], strides = [1, 1]} : vector<8x256xf32> to vector<1x16xf32>
    %c10 = arith.constant 10 : index
    %c2_16 = arith.constant 2 : index
    %27 = vector.load %arg8[%c10, %c2_16] : memref<20x20xf32, #tpu.memory_space<vmem>>, vector<1x16xf32>
    tpu.vector_store %arg8[%c10, %c2_16], %26 {strides = array<i32>} : memref<20x20xf32, #tpu.memory_space<vmem>>, vector<1x16xf32>,
    %28 = vector.extract_strided_slice %5 {offsets = [0, 144], sizes = [1, 16], strides = [1, 1]} : vector<8x256xf32> to vector<1x16xf32>
    %c11 = arith.constant 11 : index
    %c2_17 = arith.constant 2 : index
    %29 = vector.load %arg8[%c11, %c2_17] : memref<20x20xf32, #tpu.memory_space<vmem>>, vector<1x16xf32>
    tpu.vector_store %arg8[%c11, %c2_17], %28 {strides = array<i32>} : memref<20x20xf32, #tpu.memory_space<vmem>>, vector<1x16xf32>,
    %30 = vector.extract_strided_slice %5 {offsets = [0, 160], sizes = [1, 16], strides = [1, 1]} : vector<8x256xf32> to vector<1x16xf32>
    %c12 = arith.constant 12 : index
    %c2_18 = arith.constant 2 : index
    %31 = vector.load %arg8[%c12, %c2_18] : memref<20x20xf32, #tpu.memory_space<vmem>>, vector<1x16xf32>
    tpu.vector_store %arg8[%c12, %c2_18], %30 {strides = array<i32>} : memref<20x20xf32, #tpu.memory_space<vmem>>, vector<1x16xf32>,
    %32 = vector.extract_strided_slice %5 {offsets = [0, 176], sizes = [1, 16], strides = [1, 1]} : vector<8x256xf32> to vector<1x16xf32>
    %c13 = arith.constant 13 : index
    %c2_19 = arith.constant 2 : index
    %33 = vector.load %arg8[%c13, %c2_19] : memref<20x20xf32, #tpu.memory_space<vmem>>, vector<1x16xf32>
    tpu.vector_store %arg8[%c13, %c2_19], %32 {strides = array<i32>} : memref<20x20xf32, #tpu.memory_space<vmem>>, vector<1x16xf32>,
    %34 = vector.extract_strided_slice %5 {offsets = [0, 192], sizes = [1, 16], strides = [1, 1]} : vector<8x256xf32> to vector<1x16xf32>
    %c14 = arith.constant 14 : index
    %c2_20 = arith.constant 2 : index
    %35 = vector.load %arg8[%c14, %c2_20] : memref<20x20xf32, #tpu.memory_space<vmem>>, vector<1x16xf32>
    tpu.vector_store %arg8[%c14, %c2_20], %34 {strides = array<i32>} : memref<20x20xf32, #tpu.memory_space<vmem>>, vector<1x16xf32>,
    %36 = vector.extract_strided_slice %5 {offsets = [0, 208], sizes = [1, 16], strides = [1, 1]} : vector<8x256xf32> to vector<1x16xf32>
    %c15 = arith.constant 15 : index
    %c2_21 = arith.constant 2 : index
    %37 = vector.load %arg8[%c15, %c2_21] : memref<20x20xf32, #tpu.memory_space<vmem>>, vector<1x16xf32>
    tpu.vector_store %arg8[%c15, %c2_21], %36 {strides = array<i32>} : memref<20x20xf32, #tpu.memory_space<vmem>>, vector<1x16xf32>,
    %38 = vector.extract_strided_slice %5 {offsets = [0, 224], sizes = [1, 16], strides = [1, 1]} : vector<8x256xf32> to vector<1x16xf32>
    %c16 = arith.constant 16 : index
    %c2_22 = arith.constant 2 : index
    %39 = vector.load %arg8[%c16, %c2_22] : memref<20x20xf32, #tpu.memory_space<vmem>>, vector<1x16xf32>
    tpu.vector_store %arg8[%c16, %c2_22], %38 {strides = array<i32>} : memref<20x20xf32, #tpu.memory_space<vmem>>, vector<1x16xf32>,
    %40 = vector.extract_strided_slice %5 {offsets = [0, 240], sizes = [1, 16], strides = [1, 1]} : vector<8x256xf32> to vector<1x16xf32>
    %c17 = arith.constant 17 : index
    %c2_23 = arith.constant 2 : index
    %41 = vector.load %arg8[%c17, %c2_23] : memref<20x20xf32, #tpu.memory_space<vmem>>, vector<1x16xf32>
    tpu.vector_store %arg8[%c17, %c2_23], %40 {strides = array<i32>} : memref<20x20xf32, #tpu.memory_space<vmem>>, vector<1x16xf32>,
    %c0_24 = arith.constant 0 : index
    %c0_25 = arith.constant 0 : index
    %42 = vector.load %arg8[%c0_24, %c0_25] : memref<20x20xf32, #tpu.memory_space<vmem>>, vector<20x20xf32>
    %43 = vector.extract_strided_slice %42 {offsets = [0, 0], sizes = [19, 19], strides = [1, 1]} : vector<20x20xf32> to vector<19x19xf32>
    %44 = vector.extract_strided_slice %42 {offsets = [0, 1], sizes = [19, 19], strides = [1, 1]} : vector<20x20xf32> to vector<19x19xf32>
    %45 = vector.extract_strided_slice %42 {offsets = [1, 0], sizes = [19, 19], strides = [1, 1]} : vector<20x20xf32> to vector<19x19xf32>
    %46 = vector.extract_strided_slice %42 {offsets = [1, 1], sizes = [19, 19], strides = [1, 1]} : vector<20x20xf32> to vector<19x19xf32>
    %c0_26 = arith.constant 0 : index
    %47 = memref.load %arg3[%c0_26] : memref<12xf32, #tpu.memory_space<smem>>
    %48 = vector.broadcast %47 : f32 to vector<19x19xf32>
    %49 = arith.mulf %48, %43 : vector<19x19xf32>
    %c1_27 = arith.constant 1 : index
    %50 = memref.load %arg3[%c1_27] : memref<12xf32, #tpu.memory_space<smem>>
    %51 = vector.broadcast %50 : f32 to vector<19x19xf32>
    %52 = arith.mulf %51, %44 : vector<19x19xf32>
    %53 = arith.addf %49, %52 : vector<19x19xf32>
    %c2_28 = arith.constant 2 : index
    %54 = memref.load %arg3[%c2_28] : memref<12xf32, #tpu.memory_space<smem>>
    %55 = vector.broadcast %54 : f32 to vector<19x19xf32>
    %56 = arith.mulf %55, %45 : vector<19x19xf32>
    %57 = arith.addf %53, %56 : vector<19x19xf32>
    %c3_29 = arith.constant 3 : index
    %58 = memref.load %arg3[%c3_29] : memref<12xf32, #tpu.memory_space<smem>>
    %59 = vector.broadcast %58 : f32 to vector<19x19xf32>
    %60 = arith.mulf %59, %46 : vector<19x19xf32>
    %61 = arith.addf %57, %60 : vector<19x19xf32>
    %c0_30 = arith.constant 0 : index
    %62 = memref.load %arg4[%c0_30] : memref<3xf32, #tpu.memory_space<smem>>
    %63 = vector.broadcast %62 : f32 to vector<19x19xf32>
    %64 = arith.addf %61, %63 : vector<19x19xf32>
    %c0_31 = arith.constant 0 : index
    %c0_32 = arith.constant 0 : index
    %c0_33 = arith.constant 0 : index
    %c0_34 = arith.constant 0 : index
    %65 = vector.load %arg5[%c0_31, %c0_32, %c0_33, %c0_34] : memref<1x3x19x19xf32, #tpu.memory_space<vmem>>, vector<1x1x19x19xf32>
    %66 = vector.shape_cast %65 : vector<1x1x19x19xf32> to vector<19x19xf32>
    %67 = arith.addf %64, %66 : vector<19x19xf32>
    %c0_35 = arith.constant 0 : index
    %c0_36 = arith.constant 0 : index
    %c0_37 = arith.constant 0 : index
    %c0_38 = arith.constant 0 : index
    %68 = vector.load %arg6[%c0_35, %c0_36, %c0_37, %c0_38] : memref<1x3x19x19xf32, #tpu.memory_space<vmem>>, vector<1x1x19x19xf32>
    %69 = vector.shape_cast %68 : vector<1x1x19x19xf32> to vector<19x19xf32>
    %70 = arith.addf %67, %69 : vector<19x19xf32>
    %c0_39 = arith.constant 0 : index
    %c0_40 = arith.constant 0 : index
    %c0_41 = arith.constant 0 : index
    %c0_42 = arith.constant 0 : index
    %71 = vector.load %arg7[%c0_39, %c0_40, %c0_41, %c0_42] : memref<1x3x19x19xf32, #tpu.memory_space<vmem>>, vector<1x1x19x19xf32>
    %72 = vector.shape_cast %71 : vector<1x1x19x19xf32> to vector<19x19xf32>
    %73 = vector.shape_cast %70 : vector<19x19xf32> to vector<1x1x19x19xf32>
    tpu.vector_store %arg7[%c0_39, %c0_40, %c0_41, %c0_42], %73 {strides = array<i32>} : memref<1x3x19x19xf32, #tpu.memory_space<vmem>>, vector<1x1x19x19xf32>,
    %c4_43 = arith.constant 4 : index
    %74 = memref.load %arg3[%c4_43] : memref<12xf32, #tpu.memory_space<smem>>
    %75 = vector.broadcast %74 : f32 to vector<19x19xf32>
    %76 = arith.mulf %75, %43 : vector<19x19xf32>
    %c5_44 = arith.constant 5 : index
    %77 = memref.load %arg3[%c5_44] : memref<12xf32, #tpu.memory_space<smem>>
    %78 = vector.broadcast %77 : f32 to vector<19x19xf32>
    %79 = arith.mulf %78, %44 : vector<19x19xf32>
    %80 = arith.addf %76, %79 : vector<19x19xf32>
    %c6_45 = arith.constant 6 : index
    %81 = memref.load %arg3[%c6_45] : memref<12xf32, #tpu.memory_space<smem>>
    %82 = vector.broadcast %81 : f32 to vector<19x19xf32>
    %83 = arith.mulf %82, %45 : vector<19x19xf32>
    %84 = arith.addf %80, %83 : vector<19x19xf32>
    %c7_46 = arith.constant 7 : index
    %85 = memref.load %arg3[%c7_46] : memref<12xf32, #tpu.memory_space<smem>>
    %86 = vector.broadcast %85 : f32 to vector<19x19xf32>
    %87 = arith.mulf %86, %46 : vector<19x19xf32>
    %88 = arith.addf %84, %87 : vector<19x19xf32>
    %c1_47 = arith.constant 1 : index
    %89 = memref.load %arg4[%c1_47] : memref<3xf32, #tpu.memory_space<smem>>
    %90 = vector.broadcast %89 : f32 to vector<19x19xf32>
    %91 = arith.addf %88, %90 : vector<19x19xf32>
    %c0_48 = arith.constant 0 : index
    %c1_49 = arith.constant 1 : index
    %c0_50 = arith.constant 0 : index
    %c0_51 = arith.constant 0 : index
    %92 = vector.load %arg5[%c0_48, %c1_49, %c0_50, %c0_51] : memref<1x3x19x19xf32, #tpu.memory_space<vmem>>, vector<1x1x19x19xf32>
    %93 = vector.shape_cast %92 : vector<1x1x19x19xf32> to vector<19x19xf32>
    %94 = arith.addf %91, %93 : vector<19x19xf32>
    %c0_52 = arith.constant 0 : index
    %c1_53 = arith.constant 1 : index
    %c0_54 = arith.constant 0 : index
    %c0_55 = arith.constant 0 : index
    %95 = vector.load %arg6[%c0_52, %c1_53, %c0_54, %c0_55] : memref<1x3x19x19xf32, #tpu.memory_space<vmem>>, vector<1x1x19x19xf32>
    %96 = vector.shape_cast %95 : vector<1x1x19x19xf32> to vector<19x19xf32>
    %97 = arith.addf %94, %96 : vector<19x19xf32>
    %c0_56 = arith.constant 0 : index
    %c1_57 = arith.constant 1 : index
    %c0_58 = arith.constant 0 : index
    %c0_59 = arith.constant 0 : index
    %98 = vector.load %arg7[%c0_56, %c1_57, %c0_58, %c0_59] : memref<1x3x19x19xf32, #tpu.memory_space<vmem>>, vector<1x1x19x19xf32>
    %99 = vector.shape_cast %98 : vector<1x1x19x19xf32> to vector<19x19xf32>
    %100 = vector.shape_cast %97 : vector<19x19xf32> to vector<1x1x19x19xf32>
    tpu.vector_store %arg7[%c0_56, %c1_57, %c0_58, %c0_59], %100 {strides = array<i32>} : memref<1x3x19x19xf32, #tpu.memory_space<vmem>>, vector<1x1x19x19xf32>,
    %c8_60 = arith.constant 8 : index
    %101 = memref.load %arg3[%c8_60] : memref<12xf32, #tpu.memory_space<smem>>
    %102 = vector.broadcast %101 : f32 to vector<19x19xf32>
    %103 = arith.mulf %102, %43 : vector<19x19xf32>
    %c9_61 = arith.constant 9 : index
    %104 = memref.load %arg3[%c9_61] : memref<12xf32, #tpu.memory_space<smem>>
    %105 = vector.broadcast %104 : f32 to vector<19x19xf32>
    %106 = arith.mulf %105, %44 : vector<19x19xf32>
    %107 = arith.addf %103, %106 : vector<19x19xf32>
    %c10_62 = arith.constant 10 : index
    %108 = memref.load %arg3[%c10_62] : memref<12xf32, #tpu.memory_space<smem>>
    %109 = vector.broadcast %108 : f32 to vector<19x19xf32>
    %110 = arith.mulf %109, %45 : vector<19x19xf32>
    %111 = arith.addf %107, %110 : vector<19x19xf32>
    %c11_63 = arith.constant 11 : index
    %112 = memref.load %arg3[%c11_63] : memref<12xf32, #tpu.memory_space<smem>>
    %113 = vector.broadcast %112 : f32 to vector<19x19xf32>
    %114 = arith.mulf %113, %46 : vector<19x19xf32>
    %115 = arith.addf %111, %114 : vector<19x19xf32>
    %c2_64 = arith.constant 2 : index
    %116 = memref.load %arg4[%c2_64] : memref<3xf32, #tpu.memory_space<smem>>
    %117 = vector.broadcast %116 : f32 to vector<19x19xf32>
    %118 = arith.addf %115, %117 : vector<19x19xf32>
    %c0_65 = arith.constant 0 : index
    %c2_66 = arith.constant 2 : index
    %c0_67 = arith.constant 0 : index
    %c0_68 = arith.constant 0 : index
    %119 = vector.load %arg5[%c0_65, %c2_66, %c0_67, %c0_68] : memref<1x3x19x19xf32, #tpu.memory_space<vmem>>, vector<1x1x19x19xf32>
    %120 = vector.shape_cast %119 : vector<1x1x19x19xf32> to vector<19x19xf32>
    %121 = arith.addf %118, %120 : vector<19x19xf32>
    %c0_69 = arith.constant 0 : index
    %c2_70 = arith.constant 2 : index
    %c0_71 = arith.constant 0 : index
    %c0_72 = arith.constant 0 : index
    %122 = vector.load %arg6[%c0_69, %c2_70, %c0_71, %c0_72] : memref<1x3x19x19xf32, #tpu.memory_space<vmem>>, vector<1x1x19x19xf32>
    %123 = vector.shape_cast %122 : vector<1x1x19x19xf32> to vector<19x19xf32>
    %124 = arith.addf %121, %123 : vector<19x19xf32>
    %c0_73 = arith.constant 0 : index
    %c2_74 = arith.constant 2 : index
    %c0_75 = arith.constant 0 : index
    %c0_76 = arith.constant 0 : index
    %125 = vector.load %arg7[%c0_73, %c2_74, %c0_75, %c0_76] : memref<1x3x19x19xf32, #tpu.memory_space<vmem>>, vector<1x1x19x19xf32>
    %126 = vector.shape_cast %125 : vector<1x1x19x19xf32> to vector<19x19xf32>
    %127 = vector.shape_cast %124 : vector<19x19xf32> to vector<1x1x19x19xf32>
    tpu.vector_store %arg7[%c0_73, %c2_74, %c0_75, %c0_76], %127 {strides = array<i32>} : memref<1x3x19x19xf32, #tpu.memory_space<vmem>>, vector<1x1x19x19xf32>,
    return
  }
}

</mosaic_0001>

<bundles_post_ra>
// kernel: model_forward.1
= control target key start
LH: loop header
LB: loop body
LE: loop exit
PB: predicated region body
PF: predicated region fallthrough
CT: control target
= control target key end

     0   :  { %13 = vsyncpa [#allocation5], 0  ;;  %s962_s0 = inlined_call_operand.vmem [shape: f32[128,256], index: 0, kind: input, shape index: {}]   ;;  %s963_s1 = inlined_call_operand.vmem [shape: f32[8,128], index: 1, kind: input, shape index: {}]   ;;  %s964_s2 = inlined_call_operand.<no memory space> [shape: f32[1], index: 2, kind: input, shape index: {}]   ;;  %s965_s3 = inlined_call_operand.vmem [shape: f32[12], index: 3, kind: input, shape index: {}]   ;;  %s966_s4 = inlined_call_operand.vmem [shape: f32[3], index: 4, kind: input, shape index: {}]   ;;  %s967_s5 = inlined_call_operand.vmem [shape: f32[1,3,19,19], index: 5, kind: input, shape index: {}]   ;;  %s968_s6 = inlined_call_operand.vmem [shape: f32[1,3,19,19], index: 6, kind: input, shape index: {}]   ;;  %s969_s7 = inlined_call_operand.vmem [shape: f32[1,3,19,19], index: 7, kind: output, shape index: {}]  }
   0x1   :  { %s26_s26 = sshll.u32 %s965_s3, 4  ;;  %s27_s26 = int_to_ptr.vmem [resolvable:$true] %s26_s26 }
   0x2   :  { %14 = vsyncpa [#allocation7], 0  ;;  %s35_s29 = sshll.u32 %s966_s4, 4  ;;  %s560_s30 = smov [#allocation4]   ;;  %s36_s29 = int_to_ptr.vmem [resolvable:$true] %s35_s29 }
   0x3   :  { %29 = dma.vmem_to_smem %s27_s26, 16, %s560_s30, [#allocation5]  }
   0x4   :  { %s561_s8 = smov [#allocation6]  }
   0x5   :  { %38 = dma.vmem_to_smem %s36_s29, 16, %s561_s8, [#allocation7]  }
   0x6   :  { %556 = dma.done.wait [#allocation5], 16  }
   0x7   :  { %557 = vsyncadd [#allocation5], 4294967280 }
   0x8   :  { %558 = dma.done.wait [#allocation7], 16  }
   0x9   :  { %559 = vsyncadd [#allocation7], 4294967280 }
   0xa   :  { %51 = sfence }
   0xb   :  { %v84_v0 = vld [vmem:[%s962_s0 + $0xf0] sm:$0xff]  ;;  %v82_v1 = vld [vmem:[%s962_s0 + $0xe0] sm:$0xff]  ;;  %v85_v3 = vld [vmem:[%s962_s0 + $0xf8] sm:$0xff]  ;;  %vm127_vm0 = vcmask 162816   ;;  %vm132_vm1 = vcmask 154632   ;;  %v562_v33 = vmov 0.0   ;;  %v86_v34 = vstv %s964_s2 }
   0xc   :  { %87 = vmatpush.msra.mxu0 %v84_v0  ;;  %v80_v2 = vld [vmem:[%s962_s0 + $0xd0] sm:$0xff]  ;;  %v83_v4 = vld [vmem:[%s962_s0 + $0xe8] sm:$0xff]  ;;  %v78_v5 = vld [vmem:[%s962_s0 + $0xc0] sm:$0xff]  ;;  %107 = vmatpush.msra.mxu1 %v85_v3  ;;  %128 = vst.msk [vmem:[#allocation2] sm:$0xff] %vm127_vm0, %v562_v33  ;;  %s563_s24 = smov 66   ;;  %s565_s25 = smov 2  }
   0xd   :  { %v81_v6 = vld [vmem:[%s962_s0 + $0xd8] sm:$0xff]  ;;  %v76_v7 = vld [vmem:[%s962_s0 + $0xb0] sm:$0xff]  ;;  %v79_v8 = vld [vmem:[%s962_s0 + $0xc8] sm:$0xff]  ;;  %129 = vst.msk [vmem:[#allocation2 + $0x8] sm:$0xff] %vm127_vm0, %v562_v33  ;;  %s566_s26 = smov 50   ;;  %s567_s27 = smov 82  }
   0xe   :  { %88 = vmatpush.msra.mxu0 %v82_v1  ;;  %108 = vmatpush.msra.mxu1 %v83_v4  ;;  %v74_v9 = vld [vmem:[%s962_s0 + $0xa0] sm:$0xff]  ;;  %v77_v10 = vld [vmem:[%s962_s0 + $0xb8] sm:$0xff]  ;;  %v72_v11 = vld [vmem:[%s962_s0 + $0x90] sm:$0xff]  ;;  %133 = vst.msk [vmem:[#allocation2 + $0x1] sm:$0xff] %vm132_vm1, %v86_v34  ;;  %s568_s28 = smov 114   ;;  %s569_s2 = smov 18  }
   0xf   :  { %v75_v12 = vld [vmem:[%s962_s0 + $0xa8] sm:$0xff]  ;;  %v70_v13 = vld [vmem:[%s962_s0 + $0x80] sm:$0xff]  ;;  %v73_v14 = vld [vmem:[%s962_s0 + $0x98] sm:$0xff]  ;;  %s570_s29 = smov 34   ;;  %vm130_vm2 = vcmask 158720   ;;  %vm141_vm3 = vcmask 139280  }
  0x10   :  { %89 = vmatpush.msra.mxu0 %v80_v2  ;;  %109 = vmatpush.msra.mxu1 %v81_v6  ;;  %v68_v15 = vld [vmem:[%s962_s0 + $0x70] sm:$0xff]  ;;  %v71_v16 = vld [vmem:[%s962_s0 + $0x88] sm:$0xff]  ;;  %v66_v17 = vld [vmem:[%s962_s0 + $0x60] sm:$0xff]  ;;  %131 = vst.msk [vmem:[#allocation2 + $0x10] sm:$0xf] %vm130_vm2, %v562_v33  ;;  %s489_s30 = sld [smem:[#allocation4 + $0x1]] }
  0x11   :  { %v69_v18 = vld [vmem:[%s962_s0 + $0x78] sm:$0xff]  ;;  %v64_v19 = vld [vmem:[%s962_s0 + $0x50] sm:$0xff]  ;;  %v67_v20 = vld [vmem:[%s962_s0 + $0x68] sm:$0xff]  ;;  %134 = vst.msk [vmem:[#allocation2 + $0x9] sm:$0xff] %vm132_vm1, %v86_v34  ;;  %vm135_vm4 = vcmask 148488   ;;  %s493_s8 = sld [smem:[#allocation4 + $0x5]] }
  0x12   :  { %90 = vmatpush.msra.mxu0 %v78_v5  ;;  %110 = vmatpush.msra.mxu1 %v79_v8  ;;  %v62_v21 = vld [vmem:[%s962_s0 + $0x40] sm:$0xff]  ;;  %v65_v22 = vld [vmem:[%s962_s0 + $0x58] sm:$0xff]  ;;  %v60_v23 = vld [vmem:[%s962_s0 + $0x30] sm:$0xff]  ;;  %136 = vst.msk [vmem:[#allocation2 + $0x11] sm:$0x3] %vm135_vm4, %v86_v34  ;;  %s571_s9 = smov 127  }
  0x13   :  { %v63_v24 = vld [vmem:[%s962_s0 + $0x48] sm:$0xff]  ;;  %v58_v25 = vld [vmem:[%s962_s0 + $0x20] sm:$0xff]  ;;  %v61_v26 = vld [vmem:[%s962_s0 + $0x38] sm:$0xff]  ;;  %s507_s10 = sld [smem:[#allocation4 + $0x9]]  ;;  %vm240_vm5 = vcmask 1046528   ;;  %vm294_vm6 = vcmask 154624  }
  0x14   :  { %91 = vmatpush.msra.mxu0 %v76_v7  ;;  %111 = vmatpush.msra.mxu1 %v77_v10  ;;  %v56_v27 = vld [vmem:[%s962_s0 + $0x10] sm:$0xff]  ;;  %v59_v28 = vld [vmem:[%s962_s0 + $0x28] sm:$0xff]  ;;  %v54_v29 = vld [vmem:[%s962_s0] sm:$0xff]  ;;  %s491_s3 = sld [smem:[#allocation4 + $0x3]]  ;;  %vm297_vm7 = vcmask 149504  }
  0x15   :  { %v53_v30 = vld [vmem:[%s963_s1] sm:$0xff]  ;;  %v57_v31 = vld [vmem:[%s962_s0 + $0x18] sm:$0xff]  ;;  %v55_v32 = vld [vmem:[%s962_s0 + $0x8] sm:$0xff]  ;;  %s564_s0 = smov 98   ;;  %s490_s11 = sld [smem:[#allocation4 + $0x2]] }
  0x16   :  { %92 = vmatpush.msra.mxu0 %v74_v9  ;;  %112 = vmatpush.msra.mxu1 %v75_v12  ;;  %v731_v49 = vstv %s489_s30  ;;  %s494_s4 = sld [smem:[#allocation4 + $0x6]] }
  0x17   :  { %v740_v54 = vstv %s493_s8  ;;  %s508_s12 = sld [smem:[#allocation4 + $0xa]] }
  0x18   :  { %93 = vmatpush.msra.mxu0 %v72_v11  ;;  %113 = vmatpush.msra.mxu1 %v73_v14  ;;  %s495_s13 = sld [smem:[#allocation4 + $0x7]] }
  0x19   :  { %v747_v58 = vstv %s507_s10  ;;  %s509_s14 = sld [smem:[#allocation4 + $0xb]] }
  0x1a   :  { %94 = vmatpush.msra.mxu0 %v70_v13  ;;  %114 = vmatpush.msra.mxu1 %v71_v16  ;;  %v253_v61 = vstv %s491_s3  ;;  %s207_s15 = sld [smem:[#allocation4]] }
  0x1b   :  { %v233_v62 = vstv %s490_s11  ;;  %s492_s16 = sld [smem:[#allocation4 + $0x4]] }
  0x1c   :  { %95 = vmatpush.msra.mxu0 %v68_v15  ;;  %115 = vmatpush.msra.mxu1 %v69_v18  ;;  %v325_v0 = vstv %s494_s4  ;;  %s506_s17 = sld [smem:[#allocation4 + $0x8]] }
  0x1d   :  { %v417_v1 = vstv %s508_s12  ;;  %s277_s18 = sld [smem:[#allocation6]] }
  0x1e   :  { %96 = vmatpush.msra.mxu0 %v66_v17  ;;  %116 = vmatpush.msra.mxu1 %v67_v20  ;;  %v344_v12 = vstv %s495_s13  ;;  %s496_s19 = sld [smem:[#allocation6 + $0x1]] }
  0x20   :  { %97 = vmatpush.msra.mxu0 %v64_v19  ;;  %117 = vmatpush.msra.mxu1 %v65_v22 }
  0x22   :  { %98 = vmatpush.msra.mxu0 %v62_v21  ;;  %118 = vmatpush.msra.mxu1 %v63_v24 }
  0x24   :  { %99 = vmatpush.msra.mxu0 %v60_v23  ;;  %119 = vmatpush.msra.mxu1 %v61_v26 }
  0x26   :  { %100 = vmatpush.msra.mxu0 %v58_v25  ;;  %120 = vmatpush.msra.mxu1 %v59_v28 }
  0x28   :  { %101 = vmatpush.msra.mxu0 %v56_v27  ;;  %121 = vmatpush.msra.mxu1 %v57_v31 }
  0x2a   :  { %102 = vmatpush.msra.mxu0 %v54_v29  ;;  %122 = vmatpush.msra.mxu1 %v55_v32 }
  0x2b   :  { %103 = vmatmul.f32.vlgmr.msra.gmra.mxu0 %v53_v30  ;;  %123 = vmatmul.f32.vlgmr.msra.gmra.mxu1 %v53_v30 }
  0xa8   :  { %v104_v35 = vpop.f32.mrf.mxu0  ;;  %v124_v37 = vpop.f32.mrf.mxu1 }
  0xa9   :  { %v105_v36 = vadd.f32 %v104_v35, %v86_v34  ;;  %v125_v38 = vadd.f32 %v124_v37, %v86_v34  ;;  %v436_v35 = vstv %s509_s14 }
  0xab   :  { %155 = vrot.lane.b32.xlu2 %v105_v36, %s563_s24  ;;  %147 = vrot.lane.b32.xlu1 %v105_v36, %s564_s0 }
  0xac   :  { %138 = vrot.lane.b32.xlu0 %v105_v36, %s565_s25 }
  0xb3   :  { %159 = vrot.lane.b32.xlu2 %v105_v36, %s566_s26  ;;  %151 = vrot.lane.b32.xlu1 %v105_v36, %s567_s27 }
  0xb4   :  { %143 = vrot.lane.b32.xlu0 %v105_v36, %s568_s28 }
  0xbb   :  { %172 = vrot.lane.b32.xlu2 %v125_v38, %s565_s25  ;;  %167 = vrot.lane.b32.xlu1 %v105_v36, %s569_s2 }
  0xbc   :  { %163 = vrot.lane.b32.xlu0 %v105_v36, %s570_s29 }
  0xc3   :  { %184 = vrot.lane.b32.xlu2 %v125_v38, %s567_s27  ;;  %180 = vrot.lane.b32.xlu1 %v125_v38, %s564_s0 }
  0xc4   :  { %176 = vrot.lane.b32.xlu0 %v125_v38, %s568_s28 }
  0xcb   :  { %196 = vrot.lane.b32.xlu2 %v125_v38, %s570_s29  ;;  %192 = vrot.lane.b32.xlu1 %v125_v38, %s566_s26  ;;  %s510_s26 = sld [smem:[#allocation6 + $0x2]] }
  0xcc   :  { %188 = vrot.lane.b32.xlu0 %v125_v38, %s563_s24 }
  0xd4   :  { %200 = vrot.lane.b32.xlu0 %v125_v38, %s569_s2 }
 0x105   :  { %v156_v39 = vpop.permute.xlu2 %155 }
 0x106   :  { %158 = vst.msk [vmem:[#allocation2 + $0x6] sm:$0x1] %vm141_vm3, %v156_v39 }
 0x10d   :  { %v160_v40 = vpop.permute.xlu2 %159 }
 0x10e   :  { %162 = vst.msk [vmem:[#allocation2 + $0x7] sm:$0x1] %vm141_vm3, %v160_v40 }
 0x115   :  { %v173_v41 = vpop.permute.xlu2 %172 }
 0x116   :  { %175 = vst.msk [vmem:[#allocation2 + $0xa] sm:$0x1] %vm141_vm3, %v173_v41 }
 0x11d   :  { %v185_v42 = vpop.permute.xlu2 %184  ;;  %v148_v43 = vpop.permute.xlu1 %147 }
 0x11e   :  { %187 = vst.msk [vmem:[#allocation2 + $0xd] sm:$0x1] %vm141_vm3, %v185_v42  ;;  %v139_v44 = vpop.permute.xlu0 %138 }
 0x11f   :  { %150 = vst.msk [vmem:[#allocation2 + $0x4] sm:$0x1] %vm141_vm3, %v148_v43 }
 0x120   :  { %142 = vst.msk [vmem:[#allocation2 + $0x2] sm:$0x1] %vm141_vm3, %v139_v44 }
 0x125   :  { %v197_v45 = vpop.permute.xlu2 %196  ;;  %v152_v46 = vpop.permute.xlu1 %151 }
 0x126   :  { %199 = vst.msk [vmem:[#allocation2 + $0x10] sm:$0x1] %vm141_vm3, %v197_v45  ;;  %v144_v47 = vpop.permute.xlu0 %143 }
 0x127   :  { %154 = vst.msk [vmem:[#allocation2 + $0x5] sm:$0x1] %vm141_vm3, %v152_v46 }
 0x128   :  { %146 = vst.msk [vmem:[#allocation2 + $0x3] sm:$0x1] %vm141_vm3, %v144_v47 }
 0x12d   :  { %v168_v48 = vpop.permute.xlu1 %167 }
 0x12e   :  { %170 = vst.msk [vmem:[#allocation2 + $0x9] sm:$0x1] %vm141_vm3, %v168_v48  ;;  %v164_v50 = vpop.permute.xlu0 %163 }
 0x12f   :  { %v734_v51 = vld [vmem:[#allocation2] sm:$0xff]  ;;  %166 = vst.msk [vmem:[#allocation2 + $0x8] sm:$0x1] %vm141_vm3, %v164_v50 }
 0x130   :  { %v214_v52 = vmul.f32 %v731_v49, %v734_v51  ;;  %v306_v56 = vmul.f32 %v740_v54, %v734_v51  ;;  %v398_v60 = vmul.f32 %v747_v58, %v734_v51  ;;  %v254_v63 = vmul.f32 %v253_v61, %v734_v51 }
 0x131   :  { %v234_v6 = vmul.f32 %v233_v62, %v734_v51  ;;  %v326_v7 = vmul.f32 %v325_v0, %v734_v51  ;;  %v418_v8 = vmul.f32 %v417_v1, %v734_v51  ;;  %v345_v23 = vmul.f32 %v344_v12, %v734_v51 }
 0x132   :  { %220 = vrot.lane.b32.xlu1 %v214_v52, %s571_s9  ;;  %v260_v9 = vrot.slane %v254_v63, 1  ;;  %v437_v43 = vmul.f32 %v436_v35, %v734_v51 }
 0x133   :  { %v241_v18 = vrot.slane %v234_v6, 1  ;;  %v332_v20 = vrot.slane %v326_v7, 1  ;;  %v424_v22 = vrot.slane %v418_v8, 1  ;;  %v351_v33 = vrot.slane %v345_v23, 1 }
 0x134   :  { %v841_v7 = vstv %s492_s16 }
 0x135   :  { %v181_v53 = vpop.permute.xlu1 %180 }
 0x136   :  { %183 = vst.msk [vmem:[#allocation2 + $0xc] sm:$0x1] %vm141_vm3, %v181_v53  ;;  %v177_v55 = vpop.permute.xlu0 %176 }
 0x137   :  { %179 = vst.msk [vmem:[#allocation2 + $0xb] sm:$0x1] %vm141_vm3, %v177_v55 }
 0x13a   :  { %312 = vrot.lane.b32.xlu1 %v306_v56, %s571_s9 }
 0x13d   :  { %v193_v57 = vpop.permute.xlu1 %192 }
 0x13e   :  { %195 = vst.msk [vmem:[#allocation2 + $0xf] sm:$0x1] %vm141_vm3, %v193_v57  ;;  %v189_v59 = vpop.permute.xlu0 %188 }
 0x13f   :  { %191 = vst.msk [vmem:[#allocation2 + $0xe] sm:$0x1] %vm141_vm3, %v189_v59 }
 0x142   :  { %404 = vrot.lane.b32.xlu1 %v398_v60, %s571_s9 }
 0x146   :  { %v755_v2 = vld [vmem:[#allocation2 + $0x8] sm:$0xff]  ;;  %v201_v3 = vpop.permute.xlu0 %200 }
 0x147   :  { %203 = vst.msk [vmem:[#allocation2 + $0x11] sm:$0x1] %vm141_vm3, %v201_v3  ;;  %v215_v4 = vmul.f32 %v731_v49, %v755_v2  ;;  %v255_v5 = vmul.f32 %v253_v61, %v755_v2  ;;  %v235_v11 = vmul.f32 %v233_v62, %v755_v2  ;;  %v327_v13 = vmul.f32 %v325_v0, %v755_v2 }
 0x148   :  { %v419_v14 = vmul.f32 %v417_v1, %v755_v2  ;;  %v346_v16 = vmul.f32 %v344_v12, %v755_v2  ;;  %v307_v28 = vmul.f32 %v740_v54, %v755_v2  ;;  %v438_v39 = vmul.f32 %v436_v35, %v755_v2 }
 0x149   :  { %222 = vrot.lane.b32.xlu2 %v215_v4, %s571_s9  ;;  %v261_v10 = vrot.slane %v255_v5, 1  ;;  %v242_v17 = vrot.slane %v235_v11, 1  ;;  %v333_v19 = vrot.slane %v327_v13, 1  ;;  %v399_v45 = vmul.f32 %v747_v58, %v755_v2 }
 0x14a   :  { %v425_v21 = vrot.slane %v419_v14, 1  ;;  %v352_v30 = vrot.slane %v346_v16, 1  ;;  %v444_v47 = vrot.slane %v438_v39, 1  ;;  %v302_v8 = vmul.f32 %v841_v7, %v755_v2 }
 0x14b   :  { %v262_v15 = vsel %vm240_vm5, %v260_v9, %v261_v10  ;;  %v243_v24 = vsel %vm240_vm5, %v241_v18, %v242_v17  ;;  %v776_v26 = vsel %vm240_vm5, %v332_v20, %v333_v19  ;;  %v301_v9 = vmul.f32 %v841_v7, %v734_v51 }
 0x14c   :  { %265 = vrot.lane.b32.xlu1 %v262_v15, %s571_s9  ;;  %v779_v27 = vsel %vm240_vm5, %v424_v22, %v425_v21  ;;  %v353_v38 = vsel %vm240_vm5, %v351_v33, %v352_v30  ;;  %v848_v16 = vstv %s506_s17  ;;  %v289_v33 = vld [vmem:[%s968_s6 + $0x8] sm:$0xff] }
 0x14d   :  { %v393_v18 = vmul.f32 %v848_v16, %v734_v51 }
 0x14e   :  { %v773_v25 = vld [vmem:[#allocation2 + $0x10] sm:$0xf] }
 0x14f   :  { %v216_v29 = vmul.f32 %v731_v49, %v773_v25  ;;  %v786_v31 = vmul.f32 %v233_v62, %v773_v25  ;;  %v789_v32 = vmul.f32 %v325_v0, %v773_v25  ;;  %v794_v34 = vmul.f32 %v417_v1, %v773_v25 }
 0x150   :  { %v308_v46 = vmul.f32 %v740_v54, %v773_v25  ;;  %v256_v48 = vmul.f32 %v253_v61, %v773_v25  ;;  %v443_v49 = vrot.slane %v437_v43, 1  ;;  %v400_v53 = vmul.f32 %v747_v58, %v773_v25 }
 0x151   :  { %314 = vrot.lane.b32.xlu2 %v307_v28, %s571_s9  ;;  %224 = vrot.lane.b32.xlu0 %v216_v29, %s571_s9  ;;  %v244_v36 = vrot.slane %v786_v31, 1  ;;  %v335_v37 = vrot.slane %v789_v32, 1  ;;  %v427_v40 = vrot.slane %v794_v34, 1  ;;  %v347_v54 = vmul.f32 %v344_v12, %v773_v25  ;;  %v502_v32 = vld [vmem:[%s968_s6 + $0x28] sm:$0x7] }
 0x152   :  { %v445_v50 = vsel %vm240_vm5, %v443_v49, %v444_v47  ;;  %v263_v52 = vrot.slane %v256_v48, 1  ;;  %v439_v59 = vmul.f32 %v436_v35, %v773_v25  ;;  %v835_v61 = vstv %s207_s15  ;;  %v498_v49 = vld [vmem:[%s967_s5 + $0x20] sm:$0xff] }
 0x153   :  { %v245_v41 = vsel %vm240_vm5, %v242_v17, %v244_v36  ;;  %v336_v42 = vsel %vm240_vm5, %v333_v19, %v335_v37  ;;  %v428_v44 = vsel %vm240_vm5, %v425_v21, %v427_v40  ;;  %v354_v56 = vrot.slane %v347_v54, 1 }
 0x154   :  { %356 = vrot.lane.b32.xlu1 %v353_v38, %s571_s9  ;;  %v264_v55 = vsel %vm240_vm5, %v261_v10, %v263_v52  ;;  %v446_v60 = vrot.slane %v439_v59, 1  ;;  %v210_v62 = vmul.f32 %v835_v61, %v755_v2  ;;  %v209_v63 = vmul.f32 %v835_v61, %v734_v51 }
 0x155   :  { %v355_v57 = vsel %vm240_vm5, %v352_v30, %v354_v56  ;;  %v394_v17 = vmul.f32 %v848_v16, %v755_v2  ;;  %v855_v28 = vstv %s277_s18  ;;  %v283_v2 = vld [vmem:[%s967_s5 + $0x8] sm:$0xff] }
 0x156   :  { %v447_v58 = vsel %vm240_vm5, %v444_v47, %v446_v60 }
 0x159   :  { %406 = vrot.lane.b32.xlu2 %v399_v45, %s571_s9  ;;  %316 = vrot.lane.b32.xlu0 %v308_v46, %s571_s9 }
 0x15c   :  { %448 = vrot.lane.b32.xlu1 %v445_v50, %s571_s9 }
 0x161   :  { %267 = vrot.lane.b32.xlu2 %v264_v55, %s571_s9  ;;  %408 = vrot.lane.b32.xlu0 %v400_v53, %s571_s9  ;;  %v501_v53 = vld [vmem:[%s968_s6 + $0x20] sm:$0xff] }
 0x169   :  { %358 = vrot.lane.b32.xlu2 %v355_v57, %s571_s9  ;;  %269 = vrot.lane.b32.xlu0 %v263_v52, %s571_s9 }
 0x171   :  { %450 = vrot.lane.b32.xlu2 %v447_v58, %s571_s9  ;;  %360 = vrot.lane.b32.xlu0 %v354_v56, %s571_s9  ;;  %v497_v56 = vld [vmem:[%s967_s5 + $0x18] sm:$0xff] }
 0x179   :  { %452 = vrot.lane.b32.xlu0 %v446_v60, %s571_s9  ;;  %v500_v60 = vld [vmem:[%s968_s6 + $0x18] sm:$0xff] }
 0x1a3   :  { %v223_v0 = vpop.permute.xlu2 %222 }
 0x1a4   :  { %v221_v1 = vpop.permute.xlu1 %220  ;;  %v230_v3 = vadd.f32 %v223_v0, %v210_v62  ;;  %v461_v62 = vstv %s510_s26 }
 0x1a5   :  { %v229_v4 = vadd.f32 %v221_v1, %v209_v63 }
 0x1a6   :  { %v250_v5 = vadd.f32 %v245_v41, %v230_v3 }
 0x1a7   :  { %v249_v6 = vadd.f32 %v243_v24, %v229_v4  ;;  %v512_v4 = vld [vmem:[%s967_s5 + $0x38] sm:$0xff] }
 0x1ab   :  { %v315_v10 = vpop.permute.xlu2 %314 }
 0x1ac   :  { %v313_v11 = vpop.permute.xlu1 %312  ;;  %v322_v12 = vadd.f32 %v315_v10, %v302_v8  ;;  %v515_v8 = vld [vmem:[%s968_s6 + $0x38] sm:$0xff] }
 0x1ad   :  { %v321_v13 = vadd.f32 %v313_v11, %v301_v9  ;;  %v511_v11 = vld [vmem:[%s967_s5 + $0x30] sm:$0xff] }
 0x1ae   :  { %v341_v14 = vadd.f32 %v336_v42, %v322_v12  ;;  %v288_v42 = vld [vmem:[%s968_s6] sm:$0xff] }
 0x1af   :  { %v340_v15 = vadd.f32 %v776_v26, %v321_v13 }
 0x1b3   :  { %v407_v19 = vpop.permute.xlu2 %406 }
 0x1b4   :  { %v405_v20 = vpop.permute.xlu1 %404  ;;  %v414_v21 = vadd.f32 %v407_v19, %v394_v17 }
 0x1b5   :  { %v413_v22 = vadd.f32 %v405_v20, %v393_v18  ;;  %v211_v18 = vmul.f32 %v835_v61, %v773_v25 }
 0x1b6   :  { %v433_v23 = vadd.f32 %v428_v44, %v414_v21  ;;  %v369_v44 = vstv %s496_s19 }
 0x1b7   :  { %v432_v24 = vadd.f32 %v779_v27, %v413_v22  ;;  %v282_v27 = vld [vmem:[%s967_s5] sm:$0xff] }
 0x1bb   :  { %v268_v29 = vpop.permute.xlu2 %267 }
 0x1bc   :  { %v275_v26 = vadd.f32 %v268_v29, %v250_v5 }
 0x1be   :  { %v280_v30 = vadd.f32 %v855_v28, %v275_v26  ;;  %v266_v51 = vpop.permute.xlu1 %265 }
 0x1bf   :  { %v274_v35 = vadd.f32 %v266_v51, %v249_v6 }
 0x1c0   :  { %v286_v38 = vadd.f32 %v283_v2, %v280_v30  ;;  %v290_v2 = vld [vmem:[%s968_s6 + $0x10] sm:$0x7] }
 0x1c1   :  { %v279_v39 = vadd.f32 %v855_v28, %v274_v35 }
 0x1c2   :  { %v292_v41 = vadd.f32 %v289_v33, %v286_v38  ;;  %v499_v33 = vld [vmem:[%s967_s5 + $0x28] sm:$0x7] }
 0x1c3   :  { %v285_v43 = vadd.f32 %v282_v27, %v279_v39  ;;  %v359_v45 = vpop.permute.xlu2 %358  ;;  %v225_v46 = vpop.permute.xlu0 %224 }
 0x1c4   :  { %296 = vst.msk [vmem:[%s969_s7 + $0x8] sm:$0xff] %vm294_vm6, %v292_v41  ;;  %v366_v47 = vadd.f32 %v359_v45, %v341_v14  ;;  %v514_v14 = vld [vmem:[%s968_s6 + $0x30] sm:$0xff]  ;;  %v231_v20 = vadd.f32 %v225_v46, %v211_v18  ;;  %v513_v41 = vld [vmem:[%s967_s5 + $0x40] sm:$0x7] }
 0x1c5   :  { %v291_v48 = vadd.f32 %v288_v42, %v285_v43  ;;  %v516_v43 = vld [vmem:[%s968_s6 + $0x40] sm:$0x7] }
 0x1c6   :  { %v371_v50 = vadd.f32 %v369_v44, %v366_v47  ;;  %v357_v52 = vpop.permute.xlu1 %356  ;;  %v251_v21 = vadd.f32 %v244_v36, %v231_v20 }
 0x1c7   :  { %295 = vst.msk [vmem:[%s969_s7] sm:$0xff] %vm294_vm6, %v291_v48  ;;  %v365_v55 = vadd.f32 %v357_v52, %v340_v15 }
 0x1c8   :  { %v378_v54 = vadd.f32 %v498_v49, %v371_v50 }
 0x1c9   :  { %v370_v57 = vadd.f32 %v369_v44, %v365_v55 }
 0x1ca   :  { %v385_v59 = vadd.f32 %v501_v53, %v378_v54 }
 0x1cb   :  { %v377_v58 = vadd.f32 %v497_v56, %v370_v57  ;;  %v451_v63 = vpop.permute.xlu2 %450  ;;  %v317_v0 = vpop.permute.xlu0 %316 }
 0x1cc   :  { %504 = vst.msk [vmem:[%s969_s7 + $0x20] sm:$0xff] %vm294_vm6, %v385_v59  ;;  %v458_v1 = vadd.f32 %v451_v63, %v433_v23  ;;  %v303_v23 = vmul.f32 %v841_v7, %v773_v25  ;;  %v395_v7 = vmul.f32 %v848_v16, %v773_v25 }
 0x1cd   :  { %v384_v3 = vadd.f32 %v500_v60, %v377_v58 }
 0x1ce   :  { %v463_v5 = vadd.f32 %v461_v62, %v458_v1  ;;  %v449_v6 = vpop.permute.xlu1 %448  ;;  %v323_v29 = vadd.f32 %v317_v0, %v303_v23 }
 0x1cf   :  { %503 = vst.msk [vmem:[%s969_s7 + $0x18] sm:$0xff] %vm294_vm6, %v384_v3  ;;  %v457_v9 = vadd.f32 %v449_v6, %v432_v24  ;;  %v284_v24 = vld [vmem:[%s967_s5 + $0x10] sm:$0x7] }
 0x1d0   :  { %v470_v10 = vadd.f32 %v512_v4, %v463_v5  ;;  %v342_v36 = vadd.f32 %v335_v37, %v323_v29 }
 0x1d1   :  { %v462_v12 = vadd.f32 %v461_v62, %v457_v9 }
 0x1d2   :  { %v477_v13 = vadd.f32 %v515_v8, %v470_v10 }
 0x1d3   :  { %v469_v15 = vadd.f32 %v511_v11, %v462_v12  ;;  %v409_v17 = vpop.permute.xlu0 %408 }
 0x1d4   :  { %518 = vst.msk [vmem:[%s969_s7 + $0x38] sm:$0xff] %vm294_vm6, %v477_v13  ;;  %v415_v35 = vadd.f32 %v409_v17, %v395_v7 }
 0x1d5   :  { %v476_v19 = vadd.f32 %v514_v14, %v469_v15 }
 0x1d6   :  { %v434_v25 = vadd.f32 %v427_v40, %v415_v35 }
 0x1d7   :  { %517 = vst.msk [vmem:[%s969_s7 + $0x30] sm:$0xff] %vm294_vm6, %v476_v19 }
 0x1db   :  { %v270_v22 = vpop.permute.xlu0 %269 }
 0x1dc   :  { %v276_v61 = vadd.f32 %v270_v22, %v251_v21 }
 0x1de   :  { %v281_v26 = vadd.f32 %v855_v28, %v276_v61 }
 0x1e0   :  { %v287_v30 = vadd.f32 %v284_v24, %v281_v26 }
 0x1e2   :  { %v293_v31 = vadd.f32 %v290_v2, %v287_v30 }
 0x1e3   :  { %v361_v51 = vpop.permute.xlu0 %360 }
 0x1e4   :  { %298 = vst.msk [vmem:[%s969_s7 + $0x10] sm:$0x7] %vm297_vm7, %v293_v31  ;;  %v367_v28 = vadd.f32 %v361_v51, %v342_v36 }
 0x1e6   :  { %v372_v38 = vadd.f32 %v369_v44, %v367_v28 }
 0x1e8   :  { %v379_v37 = vadd.f32 %v499_v33, %v372_v38 }
 0x1ea   :  { %v386_v27 = vadd.f32 %v502_v32, %v379_v37 }
 0x1eb   :  { %v453_v16 = vpop.permute.xlu0 %452 }
 0x1ec   :  { %505 = vst.msk [vmem:[%s969_s7 + $0x28] sm:$0x7] %vm297_vm7, %v386_v27  ;;  %v459_v39 = vadd.f32 %v453_v16, %v434_v25 }
 0x1ee   :  { %v464_v42 = vadd.f32 %v461_v62, %v459_v39 }
 0x1f0   :  { %v471_v44 = vadd.f32 %v513_v41, %v464_v42 }
 0x1f2   :  { %v478_v45 = vadd.f32 %v516_v43, %v471_v44 }
 0x1f4   :  { %519 = vst.msk [vmem:[%s969_s7 + $0x40] sm:$0x7] %vm297_vm7, %v478_v45 }
 0x1f5   :  { %487 = vsyncpa [#allocation5], 1 }
 0x1f6   :  { %488 = vsyncpa [#allocation7], 1 }

</bundles_post_ra>
